<compile_context>
chip_gen: v5e
topology: v5e:2x2
jax: 0.10.0
libtpu: 0.0.40
codegen_flags: <defaults>
</compile_context>

<pallas_src>
import functools

import jax
import jax.numpy as jnp
from jax.experimental import pallas as pl
from jax.experimental.pallas import tpu as pltpu


def _hswish(x):
    return x * jnp.clip(x + 3.0, 0.0, 6.0) / 6.0


def _hsigmoid(x):
    return jnp.clip(x + 3.0, 0.0, 6.0) / 6.0


@functools.lru_cache(maxsize=None)
def _roll_sign():
    """Probe pltpu.roll's rotation direction once so the depthwise shifts are robust."""
    def probe(x_ref, o_ref):
        o_ref[...] = pltpu.roll(x_ref[...], 1, 1)

    x = jnp.arange(8 * 128, dtype=jnp.float32).reshape(8, 128)
    out = pl.pallas_call(
        probe, out_shape=jax.ShapeDtypeStruct((8, 128), jnp.float32))(x)
    if bool(jnp.all(out == jnp.roll(x, 1, axis=1))):
        return -1      # jnp.roll convention: result[i] = x[i - shift]
    if bool(jnp.all(out == jnp.roll(x, -1, axis=1))):
        return 1       # reversed convention: result[i] = x[i + shift]
    raise RuntimeError("unexpected pltpu.roll semantics")


def bottleneck_kernel(x_ref, w1_ref, w2_ref, masks_ref, w3_ref, slab_ref,
                      fc1b_ref, bn3b_ref, o_ref, *, W, K, P, Cr, use_res, roll_sign):
    nb, _, HW = x_ref.shape
    Cexp = w1_ref.shape[0]

    # Parameters: loaded once per grid step, shared by all images in the block.
    w1 = w1_ref[...]                      # (Cexp, Cin)   bf16, BN1 scale folded in
    w2 = w2_ref[...]                      # (Cexp, K*K)   f32,  BN2 scale folded in
    w3 = w3_ref[...]                      # (Cout, Cexp)  bf16, BN3 scale folded in
    masks = masks_ref[...]                # (K*K, HW)     f32 boundary masks
    slab = slab_ref[...]                  # (Cexp, 3+2Cr) f32 packed per-channel vectors
    bn1b = slab[:, 0:1]                   # (Cexp, 1)
    bn2b = slab[:, 1:2]                   # (Cexp, 1)
    fc2b = slab[:, 2:3]                   # (Cexp, 1)
    fc1w = slab[:, 3:3 + Cr]              # (Cexp, Cr)
    fc2w = slab[:, 3 + Cr:3 + 2 * Cr]     # (Cexp, Cr)
    fc1b = fc1b_ref[...]                  # (1, Cr)
    bn3b = bn3b_ref[...]                  # (Cout, 1)

    # Depthwise taps: (flat lane shift, boundary mask, per-channel weight column).
    taps = []
    for di in range(K):
        for dj in range(K):
            t = di * K + dj
            off = (di - P) * W + (dj - P)
            taps.append((off, masks[t:t + 1, :], w2[:, t:t + 1]))

    for i in range(nb):                   # static unroll over images in this block
        x_i = x_ref[i]                    # (Cin, HW) f32; pixels on the lane axis

        # conv1 (1x1) + folded BN1 + hswish : MXU matmul, pixels stay lane-dense.
        h1 = jnp.dot(w1, x_i.astype(jnp.bfloat16),
                     preferred_element_type=jnp.float32)        # (Cexp, HW)
        h1 = _hswish(h1 + bn1b)

        # depthwise KxK (stride 1) as in-register XLU rolls + boundary masks.
        acc = jnp.zeros((Cexp, HW), jnp.float32)
        for off, m, wt in taps:
            shifted = h1 if off == 0 else pltpu.roll(h1, (roll_sign * off) % HW, 1)
            acc = acc + shifted * m * wt
        h2 = _hswish(acc + bn2b)

        # SE: avg pool -> fc -> relu -> fc -> hsigmoid -> scale.  Pure VPU/XLU work
        # (no 1-row MXU matmuls), with no transposes needed in this orientation.
        y = jnp.mean(h2, axis=1, keepdims=True)                 # (Cexp, 1)
        z = jnp.sum(y * fc1w, axis=0, keepdims=True) + fc1b     # (1, Cr)
        z = jnp.maximum(z, 0.0)
        g = jnp.sum(fc2w * z, axis=1, keepdims=True) + fc2b     # (Cexp, 1)
        h2 = h2 * _hsigmoid(g)

        # conv3 (1x1) + folded BN3 + residual + hswish.
        h3 = jnp.dot(w3, h2.astype(jnp.bfloat16),
                     preferred_element_type=jnp.float32)        # (Cout, HW)
        h3 = h3 + bn3b
        if use_res:
            h3 = h3 + x_i
        o_ref[i] = _hswish(h3).astype(o_ref.dtype)


def prepare_params(raw, eps=1e-5):
    """Fold BN running stats into conv weights/biases, pack per-channel vectors."""
    def fold(g, b, m, v):
        s = g / jnp.sqrt(v + eps)
        return s, b - m * s

    s1, b1 = fold(raw["bn1_g"], raw["bn1_b"], raw["bn1_m"], raw["bn1_v"])
    s2, b2 = fold(raw["bn2_g"], raw["bn2_b"], raw["bn2_m"], raw["bn2_v"])
    s3, b3 = fold(raw["bn3_g"], raw["bn3_b"], raw["bn3_m"], raw["bn3_v"])
    Cexp = raw["conv1_w"].shape[0]
    K = raw["conv2_w"].shape[-1]

    return {
        "w1": (s1[:, None] * raw["conv1_w"]).astype(jnp.bfloat16),              # (Cexp, Cin)
        "w2": (s2[:, None] * raw["conv2_w"].reshape(Cexp, K * K)).astype(jnp.float32),
        "w3": (s3[:, None] * raw["conv3_w"]).astype(jnp.bfloat16),              # (Cout, Cexp)
        # [bn1 bias | bn2 bias | fc2 bias | fc1 weight^T | fc2 weight] -> (Cexp, 3+2Cr)
        "slab": jnp.concatenate(
            [b1[:, None], b2[:, None], raw["fc2_b"][:, None],
             raw["fc1_w"].T, raw["fc2_w"]], axis=1).astype(jnp.float32),
        "fc1b": raw["fc1_b"].reshape(1, -1).astype(jnp.float32),                # (1, Cr)
        "bn3b": b3[:, None].astype(jnp.float32),                                # (Cout, 1)
    }


def bottleneck_forward(x_nchw, kp, *, H, W, K, P, use_res, batch_block=None):
    N, Cin = x_nchw.shape[0], x_nchw.shape[1]
    HW = H * W
    x = x_nchw.reshape(N, Cin, HW).astype(jnp.float32)      # free reshape, no transpose
    Cout = kp["w3"].shape[0]
    Cr = kp["fc1b"].shape[1]

    nb = N if batch_block is None else batch_block          # whole batch in one grid step
    assert N % nb == 0

    # Precompute depthwise boundary masks host-side (keeps int div/mod off the VPU).
    r = jnp.arange(H).reshape(H, 1)
    c = jnp.arange(W).reshape(1, W)
    mask_list = []
    for di in range(K):
        for dj in range(K):
            valid = ((r + di - P >= 0) & (r + di - P < H) &
                     (c + dj - P >= 0) & (c + dj - P < W))
            mask_list.append(valid.reshape(HW))
    masks = jnp.stack(mask_list).astype(jnp.float32)         # (K*K, HW)

    kernel = functools.partial(bottleneck_kernel, W=W, K=K, P=P, Cr=Cr,
                               use_res=use_res, roll_sign=_roll_sign())

    def fullspec(arr):
        zeros = (0,) * arr.ndim
        return pl.BlockSpec(arr.shape, lambda i: zeros)

    out = pl.pallas_call(
        kernel,
        out_shape=jax.ShapeDtypeStruct((N, Cout, HW), jnp.float32),
        grid=(N // nb,),
        in_specs=[
            pl.BlockSpec((nb, Cin, HW), lambda i: (i, 0, 0)),
            fullspec(kp["w1"]), fullspec(kp["w2"]), fullspec(masks),
            fullspec(kp["w3"]), fullspec(kp["slab"]),
            fullspec(kp["fc1b"]), fullspec(kp["bn3b"]),
        ],
        out_specs=pl.BlockSpec((nb, Cout, HW), lambda i: (i, 0, 0)),
        compiler_params=pltpu.CompilerParams(
            dimension_semantics=("parallel",),        # batch shards across TCs on v7x
            vmem_limit_bytes=32 * 1024 * 1024,
        ),
    )(x, kp["w1"], kp["w2"], masks, kp["w3"], kp["slab"], kp["fc1b"], kp["bn3b"])

    return out.reshape(N, Cout, H, W)


def bottleneck_reference(x_nchw, raw, *, K, P, use_res, eps=1e-5):
    """Pure-JAX reference mirroring the PyTorch module (inference-mode BN)."""
    x = x_nchw.astype(jnp.float32)
    _, _, H, W = x.shape

    def bn(z, g, b, m, v):
        return ((z - m[None, :, None, None]) / jnp.sqrt(v[None, :, None, None] + eps)
                * g[None, :, None, None] + b[None, :, None, None])

    h1 = jnp.einsum("oc,nchw->nohw", raw["conv1_w"], x)
    h1 = _hswish(bn(h1, raw["bn1_g"], raw["bn1_b"], raw["bn1_m"], raw["bn1_v"]))
    pad = jnp.pad(h1, ((0, 0), (0, 0), (P, P), (P, P)))
    acc = jnp.zeros_like(h1)
    for di in range(K):
        for dj in range(K):
            acc = acc + pad[:, :, di:di + H, dj:dj + W] * \
                raw["conv2_w"][None, :, di, dj, None, None]
    h2 = _hswish(bn(acc, raw["bn2_g"], raw["bn2_b"], raw["bn2_m"], raw["bn2_v"]))
    y = h2.mean(axis=(2, 3))
    z = jnp.maximum(y @ raw["fc1_w"].T + raw["fc1_b"], 0.0)
    g = _hsigmoid(z @ raw["fc2_w"].T + raw["fc2_b"])
    h2 = h2 * g[:, :, None, None]
    h3 = jnp.einsum("oc,nchw->nohw", raw["conv3_w"], h2)
    h3 = bn(h3, raw["bn3_g"], raw["bn3_b"], raw["bn3_m"], raw["bn3_v"])
    if use_res:
        h3 = h3 + x
    return _hswish(h3)


if __name__ == "__main__":
    # Bottleneck(in_channels=8, out_channels=8, kernel_size=3, stride=1,
    #            expansion=2, se=True, nl='HS') -> residual connection active.
    N, Cin, H, W = 2, 8, 16, 16
    Cout, K, stride, expansion = 8, 3, 1, 2
    P = (K - 1) // 2
    Cexp = expansion * Cin
    Cr = Cexp // 4
    use_res = (stride == 1 and Cin == Cout)

    key = jax.random.PRNGKey(0)
    ks = jax.random.split(key, 32)

    def rnd(k, shape, scale=0.1):
        return jax.random.normal(k, shape, dtype=jnp.float32) * scale

    raw = {
        "conv1_w": rnd(ks[0], (Cexp, Cin)),
        "bn1_g": 1.0 + rnd(ks[1], (Cexp,)), "bn1_b": rnd(ks[2], (Cexp,)),
        "bn1_m": rnd(ks[3], (Cexp,)), "bn1_v": jnp.abs(rnd(ks[4], (Cexp,))) + 1.0,
        "conv2_w": rnd(ks[5], (Cexp, K, K)),
        "bn2_g": 1.0 + rnd(ks[6], (Cexp,)), "bn2_b": rnd(ks[7], (Cexp,)),
        "bn2_m": rnd(ks[8], (Cexp,)), "bn2_v": jnp.abs(rnd(ks[9], (Cexp,))) + 1.0,
        "fc1_w": rnd(ks[10], (Cr, Cexp)), "fc1_b": rnd(ks[11], (Cr,)),
        "fc2_w": rnd(ks[12], (Cexp, Cr)), "fc2_b": rnd(ks[13], (Cexp,)),
        "conv3_w": rnd(ks[14], (Cout, Cexp)),
        "bn3_g": 1.0 + rnd(ks[15], (Cout,)), "bn3_b": rnd(ks[16], (Cout,)),
        "bn3_m": rnd(ks[17], (Cout,)), "bn3_v": jnp.abs(rnd(ks[18], (Cout,))) + 1.0,
    }
    x = jax.random.normal(ks[19], (N, Cin, H, W), dtype=jnp.float32)

    kp = prepare_params(raw)
    out = bottleneck_forward(x, kp, H=H, W=W, K=K, P=P, use_res=use_res)
    out = jax.block_until_ready(out)

    ref = bottleneck_reference(x, raw, K=K, P=P, use_res=use_res)
    assert out.shape == (N, Cout, H, W)
    max_err = float(jnp.max(jnp.abs(out - ref)))
    assert jnp.allclose(out, ref, atol=1e-2, rtol=1e-2), \
        f"mismatch vs JAX reference (max abs err {max_err})"

    print("KERNEL_OK")
</pallas_src>

<mosaic_0001>
module attributes {stable_mosaic.version = 11 : i64} {
  func.func @probe(%arg0: memref<8x128xf32, #tpu.memory_space<vmem>>, %arg1: memref<8x128xf32, #tpu.memory_space<vmem>>) attributes {dimension_semantics = [], scalar_prefetch = 0 : i64, scratch_operands = 0 : i64, tpu.core_type = #tpu.core_type<tc>} {
    %c0 = arith.constant 0 : index
    %c0_0 = arith.constant 0 : index
    %0 = vector.load %arg0[%c0, %c0_0] : memref<8x128xf32, #tpu.memory_space<vmem>>, vector<8x128xf32>
    %c1_i32 = arith.constant 1 : i32
    %1 = tpu.dynamic_rotate %0 by %c1_i32 dim 1 : vector<8x128xf32>, i32 -> vector<8x128xf32>
    %c0_1 = arith.constant 0 : index
    %c0_2 = arith.constant 0 : index
    %2 = vector.load %arg1[%c0_1, %c0_2] : memref<8x128xf32, #tpu.memory_space<vmem>>, vector<8x128xf32>
    tpu.vector_store %arg1[%c0_1, %c0_2], %1 {strides = array<i32>} : memref<8x128xf32, #tpu.memory_space<vmem>>, vector<8x128xf32>,
    return
  }
}

</mosaic_0001>

<bundles_post_ra>
// kernel: tpu_custom_call.1
= control target key start
LH: loop header
LB: loop body
LE: loop exit
PB: predicated region body
PF: predicated region fallthrough
CT: control target
= control target key end

     0   :  { %6 = vsyncpa [#allocation3], 0  ;;  %s118_s0 = inlined_call_operand.hbm [shape: f32[8,128], index: 0, kind: input, shape index: {}]   ;;  %s119_s1 = inlined_call_operand.hbm [shape: f32[8,128], index: 1, kind: output, shape index: {}]  }
   0x1   :  { %7 = vsyncpa [#allocation4], 0  ;;  %s13_s8 = sshll.u32 %s118_s0, 4  ;;  %s99_s9 = smov [#allocation2]   ;;  %s14_s8 = int_to_ptr.hbm [resolvable:$true] %s13_s8 }
   0x2   :  { %s15_s10 = sshll.u32 %s99_s9, 4  ;;  %s16_s10 = int_to_ptr.vmem [resolvable:$true] %s15_s10 }
   0x3   :  { %18 = dma.hbm_to_vmem [thread:$0]  %s14_s8, 128, %s16_s10, [#allocation3]  }
   0x4   :  { %95 = dma.done.wait [#allocation3], 128  }
   0x5   :  { %96 = vsyncadd [#allocation3], 4294967168  ;;  %v23_v0 = vld [vmem:[#allocation2] sm:$0xff]  ;;  %s100_s11 = smov 1   ;;  %s101_s12 = smov [#allocation5]  }
   0x6   :  { %24 = vrot.lane.b32.xlu0 %v23_v0, %s100_s11  ;;  %s32_s13 = sshll.u32 %s101_s12, 4  ;;  %s34_s16 = sshll.u32 %s119_s1, 4  ;;  %s33_s13 = int_to_ptr.vmem [resolvable:$true] %s32_s13  ;;  %s35_s16 = int_to_ptr.hbm [resolvable:$true] %s34_s16 }
  0x78   :  { %v25_v1 = vpop.permute.xlu0 %24 }
  0x79   :  { %26 = vst [vmem:[#allocation5] sm:$0xff] %v25_v1 }
  0x7a   :  { %37 = dma.vmem_to_hbm [thread:$0]  %s33_s13, 128, %s35_s16, [#allocation4]  }
  0x7b   :  { %97 = dma.done.wait [#allocation4], 128  }
  0x7c   :  { %98 = vsyncadd [#allocation4], 4294967168 }
  0x7d   :  { %42 = vsyncpa [#allocation3], 1 }
  0x7e   :  { %43 = vsyncpa [#allocation4], 1 }

</bundles_post_ra>
